<compile_context>
chip_gen: v6e
topology: v6e:2x2x1
jax: 0.10.0
libtpu: 0.0.40
codegen_flags: <defaults>
</compile_context>

<pallas_src>
import functools
import math

import jax
import jax.numpy as jnp
from jax import lax
from jax.experimental import pallas as pl
from jax.experimental.pallas import tpu as pltpu


# ---------------------------------------------------------------------------
# Counter-based dropout hash (shared by kernel and pure-JAX reference).
# ---------------------------------------------------------------------------
_GOLDEN_U32 = 0x9E3779B9


def _mix_u32(h):
    """lowbias32-style integer hash; exact modular u32 math on all backends."""
    h = h ^ (h >> 16)
    h = h * jnp.uint32(0x21F0AAAD)
    h = h ^ (h >> 15)
    h = h * jnp.uint32(0x735A2D97)
    h = h ^ (h >> 15)
    return h


def _keep_threshold_u32(rate: float):
    # keep iff hash >= floor(rate * 2^32)  =>  P(keep) = 1 - rate (to 2^-32).
    return jnp.uint32(min(int(rate * 4294967296.0), 0xFFFFFFFF))


# ---------------------------------------------------------------------------
# Kernel
# ---------------------------------------------------------------------------
def _residual_ln_kernel(seed_ref, x_ref, pre_ref, gamma_ref, beta_ref, o_ref, *,
                        dropout_rate: float, eps: float, training: bool,
                        segments: int, seg_width: int):
    x = x_ref[...].astype(jnp.float32)       # (TM, W)
    pre = pre_ref[...].astype(jnp.float32)   # (TM, W)
    tm, w = x_ref.shape

    if training and dropout_rate > 0.0:
        # Hash of (seed, global flat element index).  Pure VPU integer ops:
        # works on Mosaic and in interpret mode; mask is independent of tiling
        # and of the lane-packing layout (flat C-order index is preserved).
        seed_u = seed_ref[0].astype(jnp.uint32)
        row0 = (pl.program_id(0) * tm).astype(jnp.uint32)
        r = lax.broadcasted_iota(jnp.int32, (tm, w), 0).astype(jnp.uint32)
        c = lax.broadcasted_iota(jnp.int32, (tm, w), 1).astype(jnp.uint32)
        flat = (row0 + r) * jnp.uint32(w) + c
        h = _mix_u32(flat + seed_u * jnp.uint32(_GOLDEN_U32))
        keep = h >= _keep_threshold_u32(dropout_rate)
        scale = jnp.float32(1.0 / (1.0 - dropout_rate))
        x = x * jnp.where(keep, scale, jnp.float32(0.0))

    y = x + pre
    gamma = gamma_ref[...].astype(jnp.float32)   # (1, W)
    beta = beta_ref[...].astype(jnp.float32)     # (1, W)
    eps_f = jnp.float32(eps)

    if segments == 1:
        # Plain LayerNorm over the last dim (biased variance, matches nn.LayerNorm).
        mean = jnp.mean(y, axis=-1, keepdims=True)
        centered = y - mean
        var = jnp.mean(centered * centered, axis=-1, keepdims=True)
        normed = centered * lax.rsqrt(var + eps_f)
        o_ref[...] = (normed * gamma + beta).astype(o_ref.dtype)
    else:
        # Lane-packed layout: each 128-lane row holds `segments` logical rows of
        # width seg_width.  LayerNorm independently per segment (static unroll);
        # the output block stays lane-dense (128-wide) for dense stores/DMA.
        d = seg_width
        for j in range(segments):
            sl = slice(j * d, (j + 1) * d)
            yj = y[:, sl]
            mean = jnp.mean(yj, axis=-1, keepdims=True)
            cj = yj - mean
            var = jnp.mean(cj * cj, axis=-1, keepdims=True)
            nj = cj * lax.rsqrt(var + eps_f)
            o_ref[:, sl] = (nj * gamma[:, sl] + beta[:, sl]).astype(o_ref.dtype)


# ---------------------------------------------------------------------------
# Wrapper helpers
# ---------------------------------------------------------------------------
def _round_up(v: int, m: int) -> int:
    return ((v + m - 1) // m) * m


def _vmem_budgets():
    """(tile_budget_bytes, vmem_limit_bytes) per TPU generation."""
    cap = None
    try:
        cap = getattr(pltpu.get_tpu_info(), "vmem_capacity_bytes", None)
    except Exception:
        cap = None
    if cap is not None and cap >= (96 << 20):
        # v5e / v6e: 128 MiB physical VMEM -> big tiles, big scoped limit.
        return 48 << 20, 96 << 20
    # v7x (64 MiB/TC) or unknown backend: conservative.
    return 24 << 20, 40 << 20


def _choose_tile_rows(rows: int, row_width: int, itemsize: int,
                      tile_budget: int, training: bool) -> int:
    """Largest sublane-aligned row tile fitting the VMEM budget, preferring
    an exact divisor of `rows` (balanced steps, no ragged last block)."""
    if rows <= 8:
        return rows
    # 3 operands (x, pre_x, out) x 2 pipeline buffers in I/O dtype plus f32
    # working-set temporaries (more in training: mask/hash/y/centered/normed).
    f32_temps = 8 if training else 5
    per_row = 6 * row_width * itemsize + f32_temps * row_width * 4
    t = tile_budget // max(per_row, 1)
    t = max(8, min(4096, (t // 8) * 8))
    # Keep >= 2 grid steps so the single "parallel" axis can be split across
    # the two v7x TensorCores.
    half = _round_up((rows + 1) // 2, 8)
    t = min(t, half)
    # Prefer an exact multiple-of-8 divisor of rows -> even, balanced steps.
    if rows % 8 == 0:
        d8 = rows // 8
        for cand in range(t // 8, 0, -1):
            if d8 % cand == 0:
                best = cand * 8
                if best * 2 >= t:
                    return best
                break
    return t


# ---------------------------------------------------------------------------
# Public wrapper: dropout(x) + pre_x, then LayerNorm over d_model (last dim).
# ---------------------------------------------------------------------------
def residual_connection(x, pre_x, gamma, beta, *, dropout_rate, eps,
                        training=False, seed=0, tile_rows=None):
    assert x.shape == pre_x.shape
    if training and dropout_rate >= 1.0:
        raise ValueError("dropout_rate must be < 1.0 in training mode")

    orig_shape = x.shape
    d_model = orig_shape[-1]
    rows = math.prod(orig_shape[:-1]) if len(orig_shape) > 1 else 1

    x2 = x.reshape(rows, d_model)
    pre2 = pre_x.reshape(rows, d_model)

    # Lane-dense packing for small d_model: fold k logical rows into the
    # 128-lane dimension (free C-order reshape).
    segments = 1
    if d_model < 128 and 128 % d_model == 0:
        k = 128 // d_model
        if rows % k == 0 and rows >= k:
            segments = k
    # TODO(synk): for d_model < 128 that does not divide 128 (or rows % k != 0),
    # pad the lane dim to 128 in the wrapper for dense stores.

    if segments > 1:
        rows_k = rows // segments
        width = segments * d_model
        x2 = x2.reshape(rows_k, width)
        pre2 = pre2.reshape(rows_k, width)
        gamma2 = jnp.tile(gamma.reshape(1, d_model), (1, segments))
        beta2 = jnp.tile(beta.reshape(1, d_model), (1, segments))
    else:
        rows_k = rows
        width = d_model
        gamma2 = gamma.reshape(1, d_model)
        beta2 = beta.reshape(1, d_model)

    itemsize = jnp.dtype(x.dtype).itemsize
    tile_budget, vmem_limit = _vmem_budgets()
    if tile_rows is None:
        tile_rows = _choose_tile_rows(rows_k, width, itemsize, tile_budget,
                                      bool(training) and dropout_rate > 0.0)
    tile_rows = max(1, min(int(tile_rows), rows_k))

    grid = (pl.cdiv(rows_k, tile_rows),)   # ragged last block handled by Pallas

    kernel = functools.partial(
        _residual_ln_kernel,
        dropout_rate=float(dropout_rate),
        eps=float(eps),
        training=bool(training),
        segments=segments,
        seg_width=d_model,
    )

    # seed may be a Python int or a device scalar (wrapper is jit-friendly).
    seed_arr = jnp.asarray(seed, dtype=jnp.int32).reshape((1,))

    cost = pl.CostEstimate(
        flops=int(10 * rows * d_model),
        transcendentals=int(rows),
        bytes_accessed=int(3 * rows * d_model * itemsize + 2 * d_model * 4),
    )

    out = pl.pallas_call(
        kernel,
        out_shape=jax.ShapeDtypeStruct((rows_k, width), x.dtype),
        grid_spec=pltpu.PrefetchScalarGridSpec(
            num_scalar_prefetch=1,
            grid=grid,
            in_specs=[
                pl.BlockSpec((tile_rows, width), lambda i, seed: (i, 0)),
                pl.BlockSpec((tile_rows, width), lambda i, seed: (i, 0)),
                pl.BlockSpec((1, width), lambda i, seed: (0, 0)),
                pl.BlockSpec((1, width), lambda i, seed: (0, 0)),
            ],
            out_specs=pl.BlockSpec((tile_rows, width), lambda i, seed: (i, 0)),
        ),
        compiler_params=pltpu.CompilerParams(
            dimension_semantics=("parallel",),
            vmem_limit_bytes=vmem_limit,
        ),
        cost_estimate=cost,
    )(seed_arr, x2, pre2, gamma2, beta2)

    return out.reshape(orig_shape)


# ---------------------------------------------------------------------------
# Pure-JAX references (for self-checks)
# ---------------------------------------------------------------------------
def _layernorm_ref(y, gamma, beta, eps):
    mean = y.mean(-1, keepdims=True)
    var = ((y - mean) ** 2).mean(-1, keepdims=True)
    return (y - mean) / jnp.sqrt(var + eps) * gamma + beta


def _dropout_ref(x, seed, rate):
    """Same counter-based mask the kernel uses (flat C-order element index)."""
    n = x.size
    idx = jnp.arange(n, dtype=jnp.uint32)
    h = _mix_u32(idx + jnp.uint32(seed) * jnp.uint32(_GOLDEN_U32))
    keep = (h >= _keep_threshold_u32(rate)).reshape(x.shape)
    scale = jnp.float32(1.0 / (1.0 - rate))
    return x * jnp.where(keep, scale, jnp.float32(0.0))


if __name__ == "__main__":
    batch, seq, d_model = 2, 8, 32
    dropout_rate = 0.1
    eps = 1e-6

    key = jax.random.PRNGKey(0)
    kx, kp = jax.random.split(key)
    x = jax.random.normal(kx, (batch, seq, d_model), dtype=jnp.float32)
    pre_x = jax.random.normal(kp, (batch, seq, d_model), dtype=jnp.float32)

    # nn.LayerNorm init: weight=1, bias=0
    gamma = jnp.ones((d_model,), dtype=jnp.float32)
    beta = jnp.zeros((d_model,), dtype=jnp.float32)

    # --- Eval mode (dropout = identity), lane-packed path (d_model=32) ---
    out = residual_connection(x, pre_x, gamma, beta,
                              dropout_rate=dropout_rate, eps=eps,
                              training=False, seed=0)
    jax.block_until_ready(out)
    ref = _layernorm_ref(x + pre_x, gamma, beta, eps)
    assert out.shape == x.shape
    assert jnp.allclose(out, ref, atol=1e-5, rtol=1e-5), "eval-mode mismatch"

    # --- Training mode: counter-based dropout matches the reference mask ---
    out_tr = residual_connection(x, pre_x, gamma, beta,
                                 dropout_rate=dropout_rate, eps=eps,
                                 training=True, seed=123)
    jax.block_until_ready(out_tr)
    ref_tr = _layernorm_ref(_dropout_ref(x, 123, dropout_rate) + pre_x,
                            gamma, beta, eps)
    assert out_tr.shape == x.shape
    assert bool(jnp.all(jnp.isfinite(out_tr))), "training-mode produced non-finite"
    assert jnp.allclose(out_tr, ref_tr, atol=1e-4, rtol=1e-4), "training-mode mismatch"

    # --- Lane-dense config (d_model multiple of 128), unpacked path, 2 steps ---
    d2 = 256
    k2x, k2p = jax.random.split(jax.random.PRNGKey(1))
    x2 = jax.random.normal(k2x, (batch, seq, d2), dtype=jnp.float32)
    p2 = jax.random.normal(k2p, (batch, seq, d2), dtype=jnp.float32)
    g2 = jnp.ones((d2,), dtype=jnp.float32)
    b2 = jnp.zeros((d2,), dtype=jnp.float32)
    out2 = residual_connection(x2, p2, g2, b2,
                               dropout_rate=dropout_rate, eps=eps,
                               training=False, seed=0)
    jax.block_until_ready(out2)
    ref2 = _layernorm_ref(x2 + p2, g2, b2, eps)
    assert jnp.allclose(out2, ref2, atol=1e-5, rtol=1e-5), "d_model=256 mismatch"

    # --- Ragged last block (rows not a multiple of the tile), no padding ---
    b3, s3, d3 = 3, 5, 256   # rows = 15 -> grid of 2 with a partial last block
    k3x, k3p = jax.random.split(jax.random.PRNGKey(2))
    x3 = jax.random.normal(k3x, (b3, s3, d3), dtype=jnp.float32)
    p3 = jax.random.normal(k3p, (b3, s3, d3), dtype=jnp.float32)
    g3 = jnp.ones((d3,), dtype=jnp.float32)
    b3v = jnp.zeros((d3,), dtype=jnp.float32)
    out3 = residual_connection(x3, p3, g3, b3v,
                               dropout_rate=dropout_rate, eps=eps,
                               training=False, seed=0)
    jax.block_until_ready(out3)
    ref3 = _layernorm_ref(x3 + p3, g3, b3v, eps)
    assert jnp.allclose(out3, ref3, atol=1e-5, rtol=1e-5), "ragged-block mismatch"

    print("KERNEL_OK")
</pallas_src>

<mosaic_0001>
module attributes {stable_mosaic.version = 11 : i64} {
  func.func @_residual_ln_kernel(%arg0: i32, %arg1: memref<1xi32, #tpu.memory_space<smem>>, %arg2: memref<4x128xf32, #tpu.memory_space<vmem>>, %arg3: memref<4x128xf32, #tpu.memory_space<vmem>>, %arg4: memref<1x128xf32, #tpu.memory_space<vmem>>, %arg5: memref<1x128xf32, #tpu.memory_space<vmem>>, %arg6: memref<4x128xf32, #tpu.memory_space<vmem>>) attributes {dimension_semantics = [#tpu.dimension_semantics<parallel>], iteration_bounds = array<i64: 1>, scalar_prefetch = 1 : i64, scratch_operands = 0 : i64, tpu.core_type = #tpu.core_type<tc>, window_params = [{transform_indices = @transform_0, window_bounds = array<i64: 4, 128>}, {transform_indices = @transform_1, window_bounds = array<i64: 4, 128>}, {pipeline_mode = #tpu.pipeline_mode<synchronous>, transform_indices = @transform_2, window_bounds = array<i64: 1, 128>}, {pipeline_mode = #tpu.pipeline_mode<synchronous>, transform_indices = @transform_3, window_bounds = array<i64: 1, 128>}, {transform_indices = @transform_4, window_bounds = array<i64: 4, 128>}]} {
    %c0 = arith.constant 0 : index
    %c0_0 = arith.constant 0 : index
    %0 = vector.load %arg2[%c0, %c0_0] : memref<4x128xf32, #tpu.memory_space<vmem>>, vector<4x128xf32>
    %c0_1 = arith.constant 0 : index
    %c0_2 = arith.constant 0 : index
    %1 = vector.load %arg3[%c0_1, %c0_2] : memref<4x128xf32, #tpu.memory_space<vmem>>, vector<4x128xf32>
    %2 = arith.addf %0, %1 : vector<4x128xf32>
    %c0_3 = arith.constant 0 : index
    %c0_4 = arith.constant 0 : index
    %3 = vector.load %arg4[%c0_3, %c0_4] : memref<1x128xf32, #tpu.memory_space<vmem>>, vector<1x128xf32>
    %c0_5 = arith.constant 0 : index
    %c0_6 = arith.constant 0 : index
    %4 = vector.load %arg5[%c0_5, %c0_6] : memref<1x128xf32, #tpu.memory_space<vmem>>, vector<1x128xf32>
    %5 = vector.extract_strided_slice %2 {offsets = [0, 0], sizes = [4, 32], strides = [1, 1]} : vector<4x128xf32> to vector<4x32xf32>
    %cst = arith.constant dense<0.000000e+00> : vector<4xf32>
    %6 = vector.multi_reduction <add>, %5, %cst [1] : vector<4x32xf32> to vector<4xf32>
    %7 = vector.shape_cast %6 : vector<4xf32> to vector<4x1xf32>
    %cst_7 = arith.constant 3.200000e+01 : f32
    %8 = vector.broadcast %cst_7 : f32 to vector<4x1xf32>
    %9 = arith.divf %7, %8 : vector<4x1xf32>
    %10 = vector.broadcast %9 : vector<4x1xf32> to vector<4x32xf32>
    %11 = arith.subf %5, %10 : vector<4x32xf32>
    %12 = arith.mulf %11, %11 : vector<4x32xf32>
    %cst_8 = arith.constant dense<0.000000e+00> : vector<4xf32>
    %13 = vector.multi_reduction <add>, %12, %cst_8 [1] : vector<4x32xf32> to vector<4xf32>
    %14 = vector.shape_cast %13 : vector<4xf32> to vector<4x1xf32>
    %cst_9 = arith.constant 3.200000e+01 : f32
    %15 = vector.broadcast %cst_9 : f32 to vector<4x1xf32>
    %16 = arith.divf %14, %15 : vector<4x1xf32>
    %cst_10 = arith.constant 9.99999997E-7 : f32
    %17 = vector.broadcast %cst_10 : f32 to vector<4x1xf32>
    %18 = arith.addf %16, %17 : vector<4x1xf32>
    %19 = math.rsqrt %18 : vector<4x1xf32>
    %20 = vector.broadcast %19 : vector<4x1xf32> to vector<4x32xf32>
    %21 = arith.mulf %11, %20 : vector<4x32xf32>
    %22 = vector.extract_strided_slice %3 {offsets = [0, 0], sizes = [1, 32], strides = [1, 1]} : vector<1x128xf32> to vector<1x32xf32>
    %23 = vector.broadcast %22 : vector<1x32xf32> to vector<4x32xf32>
    %24 = arith.mulf %21, %23 : vector<4x32xf32>
    %25 = vector.extract_strided_slice %4 {offsets = [0, 0], sizes = [1, 32], strides = [1, 1]} : vector<1x128xf32> to vector<1x32xf32>
    %26 = vector.broadcast %25 : vector<1x32xf32> to vector<4x32xf32>
    %27 = arith.addf %24, %26 : vector<4x32xf32>
    %c0_11 = arith.constant 0 : index
    %c0_12 = arith.constant 0 : index
    %28 = vector.load %arg6[%c0_11, %c0_12] : memref<4x128xf32, #tpu.memory_space<vmem>>, vector<4x32xf32>
    tpu.vector_store %arg6[%c0_11, %c0_12], %27 {strides = array<i32>} : memref<4x128xf32, #tpu.memory_space<vmem>>, vector<4x32xf32>,
    %29 = vector.extract_strided_slice %2 {offsets = [0, 32], sizes = [4, 32], strides = [1, 1]} : vector<4x128xf32> to vector<4x32xf32>
    %cst_13 = arith.constant dense<0.000000e+00> : vector<4xf32>
    %30 = vector.multi_reduction <add>, %29, %cst_13 [1] : vector<4x32xf32> to vector<4xf32>
    %31 = vector.shape_cast %30 : vector<4xf32> to vector<4x1xf32>
    %cst_14 = arith.constant 3.200000e+01 : f32
    %32 = vector.broadcast %cst_14 : f32 to vector<4x1xf32>
    %33 = arith.divf %31, %32 : vector<4x1xf32>
    %34 = vector.broadcast %33 : vector<4x1xf32> to vector<4x32xf32>
    %35 = arith.subf %29, %34 : vector<4x32xf32>
    %36 = arith.mulf %35, %35 : vector<4x32xf32>
    %cst_15 = arith.constant dense<0.000000e+00> : vector<4xf32>
    %37 = vector.multi_reduction <add>, %36, %cst_15 [1] : vector<4x32xf32> to vector<4xf32>
    %38 = vector.shape_cast %37 : vector<4xf32> to vector<4x1xf32>
    %cst_16 = arith.constant 3.200000e+01 : f32
    %39 = vector.broadcast %cst_16 : f32 to vector<4x1xf32>
    %40 = arith.divf %38, %39 : vector<4x1xf32>
    %cst_17 = arith.constant 9.99999997E-7 : f32
    %41 = vector.broadcast %cst_17 : f32 to vector<4x1xf32>
    %42 = arith.addf %40, %41 : vector<4x1xf32>
    %43 = math.rsqrt %42 : vector<4x1xf32>
    %44 = vector.broadcast %43 : vector<4x1xf32> to vector<4x32xf32>
    %45 = arith.mulf %35, %44 : vector<4x32xf32>
    %46 = vector.extract_strided_slice %3 {offsets = [0, 32], sizes = [1, 32], strides = [1, 1]} : vector<1x128xf32> to vector<1x32xf32>
    %47 = vector.broadcast %46 : vector<1x32xf32> to vector<4x32xf32>
    %48 = arith.mulf %45, %47 : vector<4x32xf32>
    %49 = vector.extract_strided_slice %4 {offsets = [0, 32], sizes = [1, 32], strides = [1, 1]} : vector<1x128xf32> to vector<1x32xf32>
    %50 = vector.broadcast %49 : vector<1x32xf32> to vector<4x32xf32>
    %51 = arith.addf %48, %50 : vector<4x32xf32>
    %c0_18 = arith.constant 0 : index
    %c32 = arith.constant 32 : index
    %52 = vector.load %arg6[%c0_18, %c32] : memref<4x128xf32, #tpu.memory_space<vmem>>, vector<4x32xf32>
    tpu.vector_store %arg6[%c0_18, %c32], %51 {strides = array<i32>} : memref<4x128xf32, #tpu.memory_space<vmem>>, vector<4x32xf32>,
    %53 = vector.extract_strided_slice %2 {offsets = [0, 64], sizes = [4, 32], strides = [1, 1]} : vector<4x128xf32> to vector<4x32xf32>
    %cst_19 = arith.constant dense<0.000000e+00> : vector<4xf32>
    %54 = vector.multi_reduction <add>, %53, %cst_19 [1] : vector<4x32xf32> to vector<4xf32>
    %55 = vector.shape_cast %54 : vector<4xf32> to vector<4x1xf32>
    %cst_20 = arith.constant 3.200000e+01 : f32
    %56 = vector.broadcast %cst_20 : f32 to vector<4x1xf32>
    %57 = arith.divf %55, %56 : vector<4x1xf32>
    %58 = vector.broadcast %57 : vector<4x1xf32> to vector<4x32xf32>
    %59 = arith.subf %53, %58 : vector<4x32xf32>
    %60 = arith.mulf %59, %59 : vector<4x32xf32>
    %cst_21 = arith.constant dense<0.000000e+00> : vector<4xf32>
    %61 = vector.multi_reduction <add>, %60, %cst_21 [1] : vector<4x32xf32> to vector<4xf32>
    %62 = vector.shape_cast %61 : vector<4xf32> to vector<4x1xf32>
    %cst_22 = arith.constant 3.200000e+01 : f32
    %63 = vector.broadcast %cst_22 : f32 to vector<4x1xf32>
    %64 = arith.divf %62, %63 : vector<4x1xf32>
    %cst_23 = arith.constant 9.99999997E-7 : f32
    %65 = vector.broadcast %cst_23 : f32 to vector<4x1xf32>
    %66 = arith.addf %64, %65 : vector<4x1xf32>
    %67 = math.rsqrt %66 : vector<4x1xf32>
    %68 = vector.broadcast %67 : vector<4x1xf32> to vector<4x32xf32>
    %69 = arith.mulf %59, %68 : vector<4x32xf32>
    %70 = vector.extract_strided_slice %3 {offsets = [0, 64], sizes = [1, 32], strides = [1, 1]} : vector<1x128xf32> to vector<1x32xf32>
    %71 = vector.broadcast %70 : vector<1x32xf32> to vector<4x32xf32>
    %72 = arith.mulf %69, %71 : vector<4x32xf32>
    %73 = vector.extract_strided_slice %4 {offsets = [0, 64], sizes = [1, 32], strides = [1, 1]} : vector<1x128xf32> to vector<1x32xf32>
    %74 = vector.broadcast %73 : vector<1x32xf32> to vector<4x32xf32>
    %75 = arith.addf %72, %74 : vector<4x32xf32>
    %c0_24 = arith.constant 0 : index
    %c64 = arith.constant 64 : index
    %76 = vector.load %arg6[%c0_24, %c64] : memref<4x128xf32, #tpu.memory_space<vmem>>, vector<4x32xf32>
    tpu.vector_store %arg6[%c0_24, %c64], %75 {strides = array<i32>} : memref<4x128xf32, #tpu.memory_space<vmem>>, vector<4x32xf32>,
    %77 = vector.extract_strided_slice %2 {offsets = [0, 96], sizes = [4, 32], strides = [1, 1]} : vector<4x128xf32> to vector<4x32xf32>
    %cst_25 = arith.constant dense<0.000000e+00> : vector<4xf32>
    %78 = vector.multi_reduction <add>, %77, %cst_25 [1] : vector<4x32xf32> to vector<4xf32>
    %79 = vector.shape_cast %78 : vector<4xf32> to vector<4x1xf32>
    %cst_26 = arith.constant 3.200000e+01 : f32
    %80 = vector.broadcast %cst_26 : f32 to vector<4x1xf32>
    %81 = arith.divf %79, %80 : vector<4x1xf32>
    %82 = vector.broadcast %81 : vector<4x1xf32> to vector<4x32xf32>
    %83 = arith.subf %77, %82 : vector<4x32xf32>
    %84 = arith.mulf %83, %83 : vector<4x32xf32>
    %cst_27 = arith.constant dense<0.000000e+00> : vector<4xf32>
    %85 = vector.multi_reduction <add>, %84, %cst_27 [1] : vector<4x32xf32> to vector<4xf32>
    %86 = vector.shape_cast %85 : vector<4xf32> to vector<4x1xf32>
    %cst_28 = arith.constant 3.200000e+01 : f32
    %87 = vector.broadcast %cst_28 : f32 to vector<4x1xf32>
    %88 = arith.divf %86, %87 : vector<4x1xf32>
    %cst_29 = arith.constant 9.99999997E-7 : f32
    %89 = vector.broadcast %cst_29 : f32 to vector<4x1xf32>
    %90 = arith.addf %88, %89 : vector<4x1xf32>
    %91 = math.rsqrt %90 : vector<4x1xf32>
    %92 = vector.broadcast %91 : vector<4x1xf32> to vector<4x32xf32>
    %93 = arith.mulf %83, %92 : vector<4x32xf32>
    %94 = vector.extract_strided_slice %3 {offsets = [0, 96], sizes = [1, 32], strides = [1, 1]} : vector<1x128xf32> to vector<1x32xf32>
    %95 = vector.broadcast %94 : vector<1x32xf32> to vector<4x32xf32>
    %96 = arith.mulf %93, %95 : vector<4x32xf32>
    %97 = vector.extract_strided_slice %4 {offsets = [0, 96], sizes = [1, 32], strides = [1, 1]} : vector<1x128xf32> to vector<1x32xf32>
    %98 = vector.broadcast %97 : vector<1x32xf32> to vector<4x32xf32>
    %99 = arith.addf %96, %98 : vector<4x32xf32>
    %c0_30 = arith.constant 0 : index
    %c96 = arith.constant 96 : index
    %100 = vector.load %arg6[%c0_30, %c96] : memref<4x128xf32, #tpu.memory_space<vmem>>, vector<4x32xf32>
    tpu.vector_store %arg6[%c0_30, %c96], %99 {strides = array<i32>} : memref<4x128xf32, #tpu.memory_space<vmem>>, vector<4x32xf32>,
    return
  }
  func.func @transform_0(%arg0: i32, %arg1: memref<1xi32, #tpu.memory_space<smem>>) -> (i32, i32) {
    %c0_i32 = arith.constant 0 : i32
    %c0_i32_0 = arith.constant 0 : i32
    return %arg0, %c0_i32 : i32, i32
  }
  func.func @transform_1(%arg0: i32, %arg1: memref<1xi32, #tpu.memory_space<smem>>) -> (i32, i32) {
    %c0_i32 = arith.constant 0 : i32
    %c0_i32_0 = arith.constant 0 : i32
    return %arg0, %c0_i32 : i32, i32
  }
  func.func @transform_2(%arg0: i32, %arg1: memref<1xi32, #tpu.memory_space<smem>>) -> (i32, i32) {
    %c0_i32 = arith.constant 0 : i32
    %c0_i32_0 = arith.constant 0 : i32
    %c0_i32_1 = arith.constant 0 : i32
    return %c0_i32, %c0_i32_0 : i32, i32
  }
  func.func @transform_3(%arg0: i32, %arg1: memref<1xi32, #tpu.memory_space<smem>>) -> (i32, i32) {
    %c0_i32 = arith.constant 0 : i32
    %c0_i32_0 = arith.constant 0 : i32
    %c0_i32_1 = arith.constant 0 : i32
    return %c0_i32, %c0_i32_0 : i32, i32
  }
  func.func @transform_4(%arg0: i32, %arg1: memref<1xi32, #tpu.memory_space<smem>>) -> (i32, i32) {
    %c0_i32 = arith.constant 0 : i32
    %c0_i32_0 = arith.constant 0 : i32
    return %arg0, %c0_i32 : i32, i32
  }
}

</mosaic_0001>

<bundles_post_ra>
// kernel: tpu_custom_call.1
= control target key start
LH: loop header
LB: loop body
LE: loop exit
PB: predicated region body
PF: predicated region fallthrough
CT: control target
= control target key end

     0   :  { %11 = vsyncpa [#allocation5], 0  ;;  %s310_s0 = inlined_call_operand.<no memory space> [shape: s32[1], index: 0, kind: input, shape index: {}]   ;;  %s311_s1 = inlined_call_operand.hbm [shape: f32[4,128], index: 1, kind: input, shape index: {}]   ;;  %s312_s2 = inlined_call_operand.hbm [shape: f32[4,128], index: 2, kind: input, shape index: {}]   ;;  %s313_s3 = inlined_call_operand.vmem [shape: f32[1,128], index: 3, kind: input, shape index: {}]   ;;  %s314_s4 = inlined_call_operand.vmem [shape: f32[1,128], index: 4, kind: input, shape index: {}]   ;;  %s315_s5 = inlined_call_operand.hbm [shape: f32[4,128], index: 5, kind: output, shape index: {}]  }
   0x1   :  { %12 = vsyncpa [#allocation8], 0 }
   0x2   :  { %13 = vsyncpa [#allocation6], 0  ;;  %s250_s18 = smov [#allocation4]   ;;  %s251_s19 = smov [#allocation7]  }
   0x3   :  { %s20_s0 = sshll.u32 %s250_s18, 4  ;;  %s30_s20 = sshll.u32 %s251_s19, 4  ;;  %s21_s0 = int_to_ptr.vmem [resolvable:$true] %s20_s0  ;;  %s31_s20 = int_to_ptr.vmem [resolvable:$true] %s30_s20 }
   0x4   :  { %s192_s21 = scalar_lea.vmem %s21_s0, 64  ;;  %p197_p1 = scmp.lt.s32.totalorder %s21_s0, %s21_s0 }
   0x5   :  { %p193_p0 = scmp.ne.s32.totalorder %s21_s0, %s192_s21  ;;  %p198_p2 = scmp.lt.s32.totalorder %s192_s21, %s192_s21 }
   0x7   :  { %p199_p3 = por %p198_p2, %p197_p1 }
   0x9   :  { %p200_p4 = pnand %p199_p3, %p193_p0 }
   0xb   :  { %203 = shalt.err (!%p200_p4)
}
   0xc   :  { %23 = dma.hbm_to_vmem [thread:$0]  %s311_s1, 64, %s21_s0, [#allocation5]  }
   0xd   :  { %s212_s24 = scalar_lea.vmem %s31_s20, 64  ;;  %p217_p6 = scmp.lt.s32.totalorder %s31_s20, %s31_s20 }
   0xe   :  { %p213_p5 = scmp.ne.s32.totalorder %s31_s20, %s212_s24  ;;  %p218_p7 = scmp.lt.s32.totalorder %s212_s24, %s212_s24 }
  0x10   :  { %p219_p8 = por %p218_p7, %p217_p6 }
  0x12   :  { %p220_p9 = pnand %p219_p8, %p213_p5 }
  0x14   :  { %223 = shalt.err (!%p220_p9)
}
  0x15   :  { %33 = dma.hbm_to_vmem [thread:$0]  %s312_s2, 64, %s31_s20, [#allocation8]  }
  0x16   :  { %244 = dma.done.wait [#allocation5], 64  }
  0x17   :  { %245 = vsyncadd [#allocation5], 4294967232 }
  0x18   :  { %246 = dma.done.wait [#allocation8], 64  }
  0x19   :  { %247 = vsyncadd [#allocation8], 4294967232  ;;  %v44_v0 = vld [vmem:[#allocation4] sm:$0xf]  ;;  %v45_v1 = vld [vmem:[#allocation7] sm:$0xf] }
  0x1a   :  { %v46_v2 = vadd.f32 %v45_v1, %v44_v0  ;;  %s252_s27 = smov 96   ;;  %s253_s1 = smov 32   ;;  %vm49_vm0 = vcmask 257024   ;;  %v168_v37 = vld [vmem:[%s313_s3] ss:$0 sm:$0xff]  ;;  %vm102_vm1 = vcmask 519424  }
  0x1b   :  { %s254_s28 = smov 64   ;;  %v169_v39 = vld [vmem:[%s314_s4] ss:$0 sm:$0xff]  ;;  %vm126_vm2 = vcmask 781824   ;;  %s255_s3 = smov [#allocation9]   ;;  %vm150_vm3 = vcmask 1044224  }
  0x1c   :  { %80 = vrot.lane.b32.xlu0 %v46_v2, %s252_s27  ;;  %128 = vrot.lane.b32.xlu1 %v46_v2, %s253_s1  ;;  %v50_v5 = vsel %vm49_vm0, %v46_v2, 0.0  ;;  %s158_s4 = sshll.u32 %s255_s3, 4  ;;  %s159_s4 = int_to_ptr.vmem [resolvable:$true] %s158_s4 }
  0x1d   :  { %s224_s7 = scalar_lea.vmem %s159_s4, 64  ;;  %p229_p11 = scmp.lt.s32.totalorder %s159_s4, %s159_s4 }
  0x1e   :  { %p225_p10 = scmp.ne.s32.totalorder %s159_s4, %s224_s7  ;;  %p230_p12 = scmp.lt.s32.totalorder %s224_s7, %s224_s7 }
  0x20   :  { %104 = vrot.lane.b32.xlu0 %v46_v2, %s254_s28  ;;  %p231_p13 = por %p230_p12, %p229_p11 }
  0x22   :  { %p232_p0 = pnand %p231_p13, %p225_p10 }
  0x8e   :  { %v81_v3 = vpop.permute.xlu0 %80  ;;  %v129_v7 = vpop.permute.xlu1 %128 }
  0x8f   :  { %v83_v4 = vsel %vm49_vm0, %v81_v3, 0.0  ;;  %v131_v9 = vsel %vm49_vm0, %v129_v7, 0.0 }
  0x90   :  { %84 = vadd.xlane.f32.xlu1 %v83_v4 }
  0x92   :  { %v105_v6 = vpop.permute.xlu0 %104 }
  0x93   :  { %v107_v8 = vsel %vm49_vm0, %v105_v6, 0.0 }
  0x94   :  { %108 = vadd.xlane.f32.xlu0 %v107_v8  ;;  %51 = vadd.xlane.f32.xlu1 %v50_v5 }
  0x98   :  { %132 = vadd.xlane.f32.xlu0 %v131_v9 }
 0x119   :  { %v85_v10 = vpop.xlane.xlu1 %84 }
 0x11a   :  { %v86_v11 = vmul.f32 0.03125, %v85_v10 }
 0x11c   :  { %v87_v12 = vsub.f32 %v46_v2, %v86_v11 }
 0x11d   :  { %v109_v13 = vpop.xlane.xlu0 %108  ;;  %v52_v22 = vpop.xlane.xlu1 %51 }
 0x11e   :  { %v110_v14 = vmul.f32 0.03125, %v109_v13  ;;  %v88_v15 = vmul.f32 %v87_v12, %v87_v12  ;;  %v54_v23 = vmul.f32 0.03125, %v52_v22 }
 0x120   :  { %v111_v16 = vsub.f32 %v46_v2, %v110_v14  ;;  %90 = vrot.lane.b32.xlu0 %v88_v15, %s252_s27  ;;  %v55_v24 = vsub.f32 %v46_v2, %v54_v23 }
 0x121   :  { %v133_v17 = vpop.xlane.xlu0 %132 }
 0x122   :  { %v134_v18 = vmul.f32 0.03125, %v133_v17  ;;  %v112_v19 = vmul.f32 %v111_v16, %v111_v16  ;;  %v56_v25 = vmul.f32 %v55_v24, %v55_v24 }
 0x124   :  { %v135_v20 = vsub.f32 %v46_v2, %v134_v18  ;;  %114 = vrot.lane.b32.xlu1 %v112_v19, %s254_s28  ;;  %v57_v26 = vsel %vm49_vm0, %v56_v25, 0.0 }
 0x126   :  { %v136_v21 = vmul.f32 %v135_v20, %v135_v20 }
 0x128   :  { %138 = vrot.lane.b32.xlu1 %v136_v21, %s253_s1 }
 0x13f   :  { %58 = vadd.xlane.f32.xlu0 %v57_v26 }
 0x192   :  { %v91_v27 = vpop.permute.xlu0 %90 }
 0x193   :  { %v93_v28 = vsel %vm49_vm0, %v91_v27, 0.0 }
 0x194   :  { %94 = vadd.xlane.f32.xlu1 %v93_v28 }
 0x196   :  { %v115_v29 = vpop.permute.xlu1 %114 }
 0x197   :  { %v117_v30 = vsel %vm49_vm0, %v115_v29, 0.0 }
 0x198   :  { %118 = vadd.xlane.f32.xlu0 %v117_v30 }
 0x19a   :  { %v139_v31 = vpop.permute.xlu1 %138 }
 0x19b   :  { %v141_v32 = vsel %vm49_vm0, %v139_v31, 0.0 }
 0x19c   :  { %142 = vadd.xlane.f32.xlu0 %v141_v32 }
 0x1c8   :  { %v59_v33 = vpop.xlane.xlu0 %58 }
 0x1c9   :  { %v60_v34 = vmul.f32 0.03125, %v59_v33 }
 0x1cb   :  { %v61_v35 = vadd.f32 1e-06, %v60_v34 }
 0x1cd   :  { %176 = vrsqrt.f32 %v61_v35 }
 0x1da   :  { %v177_v36 = vpop.eup %176 }
 0x1db   :  { %v63_v38 = vmul.f32 %v177_v36, %v55_v24 }
 0x1dd   :  { %v70_v40 = vmul.f32 %v168_v37, %v63_v38 }
 0x1df   :  { %v77_v41 = vadd.f32 %v169_v39, %v70_v40 }
 0x1e1   :  { %78 = vst.msk [vmem:[#allocation9] sm:$0xf] %vm49_vm0, %v77_v41 }
 0x21d   :  { %v95_v42 = vpop.xlane.xlu1 %94 }
 0x21e   :  { %v96_v43 = vmul.f32 0.03125, %v95_v42 }
 0x220   :  { %v97_v44 = vadd.f32 1e-06, %v96_v43 }
 0x221   :  { %v119_v45 = vpop.xlane.xlu0 %118 }
 0x222   :  { %178 = vrsqrt.f32 %v97_v44  ;;  %v120_v46 = vmul.f32 0.03125, %v119_v45 }
 0x224   :  { %v121_v47 = vadd.f32 1e-06, %v120_v46 }
 0x225   :  { %v143_v48 = vpop.xlane.xlu0 %142 }
 0x226   :  { %180 = vrsqrt.f32 %v121_v47  ;;  %v144_v49 = vmul.f32 0.03125, %v143_v48 }
 0x228   :  { %v145_v50 = vadd.f32 1e-06, %v144_v49 }
 0x22a   :  { %182 = vrsqrt.f32 %v145_v50 }
 0x22f   :  { %v179_v51 = vpop.eup %178 }
 0x230   :  { %v99_v52 = vmul.f32 %v179_v51, %v87_v12 }
 0x232   :  { %v100_v53 = vmul.f32 %v168_v37, %v99_v52 }
 0x233   :  { %v181_v54 = vpop.eup %180 }
 0x234   :  { %v123_v55 = vmul.f32 %v181_v54, %v111_v16  ;;  %v101_v56 = vadd.f32 %v169_v39, %v100_v53 }
 0x236   :  { %103 = vst.msk [vmem:[#allocation9] sm:$0xf] %vm102_vm1, %v101_v56  ;;  %v124_v57 = vmul.f32 %v168_v37, %v123_v55 }
 0x237   :  { %v183_v58 = vpop.eup %182 }
 0x238   :  { %v125_v59 = vadd.f32 %v169_v39, %v124_v57  ;;  %v147_v60 = vmul.f32 %v183_v58, %v135_v20 }
 0x23a   :  { %127 = vst.msk [vmem:[#allocation9] sm:$0xf] %vm126_vm2, %v125_v59  ;;  %v148_v61 = vmul.f32 %v168_v37, %v147_v60 }
 0x23c   :  { %v149_v62 = vadd.f32 %v169_v39, %v148_v61 }
 0x23e   :  { %151 = vst.msk [vmem:[#allocation9] sm:$0xf] %vm150_vm3, %v149_v62 }
 0x23f   :  { %235 = shalt.err (!%p232_p0)
}
 0x240   :  { %161 = dma.vmem_to_hbm [thread:$0]  %s159_s4, 64, %s315_s5, [#allocation6]  }
 0x241   :  { %248 = dma.done.wait [#allocation6], 64  }
 0x242   :  { %249 = vsyncadd [#allocation6], 4294967232 }
 0x243   :  { %165 = vsyncpa [#allocation5], 1 }
 0x244   :  { %166 = vsyncpa [#allocation8], 1 }
 0x245   :  { %167 = vsyncpa [#allocation6], 1 }

</bundles_post_ra>
